<compile_context>
chip_gen: v7x
topology: tpu7x:2x2x1
jax: 0.10.0
libtpu: 0.0.40
codegen_flags: <defaults>
</compile_context>

<pallas_src>
import functools

import jax
import jax.numpy as jnp
import numpy as np
from jax import lax
from jax.experimental import pallas as pl
from jax.experimental.pallas import tpu as pltpu


# ----------------------------------------------------------------------------
# Kernel 1: fused QKV projection (one wide GEMM over all tokens).
# ----------------------------------------------------------------------------
def qkv_proj_kernel(x_ref, wqkv_ref, bqkv_ref, q_ref, k_ref, v_ref, *, d_model):
    """x_ref: (TM, D); wqkv_ref: (D, 3D); bqkv_ref: (1, 3D) f32;
    q/k/v_ref: (TM, D) in compute dtype."""
    y = jnp.dot(x_ref[...], wqkv_ref[...],
                preferred_element_type=jnp.float32) + bqkv_ref[...]
    y = y.astype(q_ref.dtype)
    q_ref[...] = y[:, :d_model]
    k_ref[...] = y[:, d_model:2 * d_model]
    v_ref[...] = y[:, 2 * d_model:]


# ----------------------------------------------------------------------------
# Kernel 2: attention + output projection for one (batch, q-tile) grid step.
# ----------------------------------------------------------------------------
def attn_kernel(q_ref, k_ref, v_ref, wo_ref, bo_ref, o_ref, ctx_ref, *,
                num_heads, head_dim, approx_recip):
    """q_ref: (1, TQ, D); k_ref/v_ref: (1, S, D)  (compute dtype)
    wo_ref: (D, D) Wo^T (compute dtype); bo_ref: (1, D) f32
    o_ref: (1, TQ, D); ctx_ref: VMEM scratch (TQ, D) compute dtype."""
    cdt = wo_ref.dtype
    scale = jnp.float32(1.0 / np.sqrt(head_dim))

    q = q_ref[0]                                   # (TQ, D) compute dtype
    k = k_ref[0]                                   # (S,  D)
    v = v_ref[0]                                   # (S,  D)

    # Static per-head loop; each head's context is written into its column
    # block of the ctx scratch so the out-projection is one full-D matmul.
    for h in range(num_heads):
        sl = slice(h * head_dim, (h + 1) * head_dim)
        # scores = qh @ kh^T in compute dtype, f32 accumulation.
        s = lax.dot_general(q[:, sl], k[:, sl], (((1,), (1,)), ((), ())),
                            preferred_element_type=jnp.float32) * scale  # (TQ, S)
        s = s - jnp.max(s, axis=-1, keepdims=True)
        p = jnp.exp(s)
        # EUP reciprocal on the bf16 path, exact on the f32 path.
        p = p * pl.reciprocal(jnp.sum(p, axis=-1, keepdims=True),
                              approx=approx_recip)
        ctx_ref[:, sl] = jnp.dot(p.astype(cdt), v[:, sl],
                                 preferred_element_type=jnp.float32).astype(cdt)

    # One full-contraction output projection (D-wide K on the MXU).
    out = jnp.dot(ctx_ref[...], wo_ref[...],
                  preferred_element_type=jnp.float32) + bo_ref[...]
    o_ref[0] = out.astype(o_ref.dtype)


# ----------------------------------------------------------------------------
# Wrapper
# ----------------------------------------------------------------------------
def _vmem_limit_bytes():
    """Generation-aware scoped-VMEM limit: ~3/4 of physical capacity."""
    fallback = 64 * 1024 * 1024           # conservative (v7x-class) assumption
    try:
        info = pltpu.get_tpu_info()
        cap = int(getattr(info, "vmem_capacity_bytes", fallback))
    except Exception:
        cap = fallback
    return max(cap * 3 // 4, 16 * 1024 * 1024)


def _row_tile(n, candidates=(512, 256, 128, 64, 32, 16, 8)):
    if n <= candidates[0]:
        return n
    for t in candidates:
        if n % t == 0:
            return t
    return n


def multi_head_self_attention(x, params, *, num_heads, q_tile=256,
                              compute_dtype=jnp.float32):
    """x: (B, S, D) float32.

    params (PyTorch layout): wq/wk/wv/wo : (D, D) (out, in); bq/bk/bv/bo : (1, D).
    """
    B, S, D = x.shape
    assert D % num_heads == 0
    head_dim = D // num_heads
    vmem_limit = _vmem_limit_bytes()
    approx_recip = jnp.dtype(compute_dtype) != jnp.dtype(jnp.float32)

    # Fused, pre-transposed QKV weights (in, 3*out); biases stay f32.
    wqkv = jnp.concatenate(
        [params["wq"].T, params["wk"].T, params["wv"].T], axis=1
    ).astype(compute_dtype)                                   # (D, 3D)
    bqkv = jnp.concatenate(
        [params["bq"], params["bk"], params["bv"]], axis=1
    ).astype(jnp.float32)                                     # (1, 3D)
    wo_t = params["wo"].T.astype(compute_dtype)               # (D, D)
    bo = params["bo"].astype(jnp.float32)                     # (1, D)

    # Pre-cast activations on the bf16 path (halves the x DMA, no in-kernel cast).
    x_in = x.astype(compute_dtype)

    # ---- 1) QKV projection: one (B*S, D) @ (D, 3D) GEMM ---------------------
    n_rows = B * S
    tm = _row_tile(n_rows)
    assert n_rows % tm == 0
    x_flat = x_in.reshape(n_rows, D)

    q, k, v = pl.pallas_call(
        functools.partial(qkv_proj_kernel, d_model=D),
        out_shape=tuple(jax.ShapeDtypeStruct((n_rows, D), compute_dtype)
                        for _ in range(3)),
        grid_spec=pltpu.PrefetchScalarGridSpec(
            num_scalar_prefetch=0,
            grid=(n_rows // tm,),
            in_specs=[pl.BlockSpec((tm, D), lambda i: (i, 0)),
                      pl.BlockSpec((D, 3 * D), lambda i: (0, 0)),
                      pl.BlockSpec((1, 3 * D), lambda i: (0, 0))],
            out_specs=tuple(pl.BlockSpec((tm, D), lambda i: (i, 0))
                            for _ in range(3)),
        ),
        compiler_params=pltpu.CompilerParams(
            dimension_semantics=("parallel",),
            vmem_limit_bytes=vmem_limit),
    )(x_flat, wqkv, bqkv)

    q = q.reshape(B, S, D)
    k = k.reshape(B, S, D)
    v = v.reshape(B, S, D)

    # ---- 2) Attention + output projection -----------------------------------
    tq = S if S <= q_tile else q_tile
    assert S % tq == 0, "sequence length must be divisible by the q tile"
    n_q = S // tq

    kernel = functools.partial(attn_kernel, num_heads=num_heads,
                               head_dim=head_dim, approx_recip=approx_recip)

    q_spec = pl.BlockSpec((1, tq, D), lambda b, qi: (b, qi, 0))
    # Constant over qi -> K/V re-DMA'd only when the batch index changes.
    kv_spec = pl.BlockSpec((1, S, D), lambda b, qi: (b, 0, 0))
    wo_spec = pl.BlockSpec((D, D), lambda b, qi: (0, 0))
    bo_spec = pl.BlockSpec((1, D), lambda b, qi: (0, 0))
    out_spec = pl.BlockSpec((1, tq, D), lambda b, qi: (b, qi, 0))

    return pl.pallas_call(
        kernel,
        out_shape=jax.ShapeDtypeStruct((B, S, D), x.dtype),
        grid_spec=pltpu.PrefetchScalarGridSpec(
            num_scalar_prefetch=0,
            grid=(B, n_q),
            in_specs=[q_spec, kv_spec, kv_spec, wo_spec, bo_spec],
            out_specs=out_spec,
            scratch_shapes=[pltpu.VMEM((tq, D), compute_dtype)],
        ),
        compiler_params=pltpu.CompilerParams(
            dimension_semantics=("parallel", "parallel"),
            vmem_limit_bytes=vmem_limit),
    )(q, k, v, wo_t, bo)


# ----------------------------------------------------------------------------
# Pure-JAX reference (matches the PyTorch module) + init
# ----------------------------------------------------------------------------
def reference_mhsa(x, params, *, num_heads):
    B, S, D = x.shape
    hd = D // num_heads

    def lin(v, w, b):
        return v @ w.T + b

    q = lin(x, params["wq"], params["bq"]).reshape(B, S, num_heads, hd).transpose(0, 2, 1, 3)
    k = lin(x, params["wk"], params["bk"]).reshape(B, S, num_heads, hd).transpose(0, 2, 1, 3)
    v = lin(x, params["wv"], params["bv"]).reshape(B, S, num_heads, hd).transpose(0, 2, 1, 3)
    scores = jnp.einsum("bhqd,bhkd->bhqk", q, k) / np.sqrt(hd)
    probs = jax.nn.softmax(scores, axis=-1)
    out = jnp.einsum("bhqk,bhkd->bhqd", probs, v)
    out = out.transpose(0, 2, 1, 3).reshape(B, S, D)
    return lin(out, params["wo"], params["bo"])


def init_params(key, d_model):
    """Deterministic PyTorch-nn.Linear-style init: U(-1/sqrt(in), 1/sqrt(in))."""
    bound = 1.0 / np.sqrt(d_model)
    keys = jax.random.split(key, 8)

    def u(k, shape):
        return jax.random.uniform(k, shape, jnp.float32, -bound, bound)

    return {
        "wq": u(keys[0], (d_model, d_model)), "bq": u(keys[1], (1, d_model)),
        "wk": u(keys[2], (d_model, d_model)), "bk": u(keys[3], (1, d_model)),
        "wv": u(keys[4], (d_model, d_model)), "bv": u(keys[5], (1, d_model)),
        "wo": u(keys[6], (d_model, d_model)), "bo": u(keys[7], (1, d_model)),
    }


if __name__ == "__main__":
    B, S, D, H = 2, 8, 32, 4

    key = jax.random.PRNGKey(0)
    kx, kp = jax.random.split(key)
    x = jax.random.normal(kx, (B, S, D), jnp.float32)
    params = init_params(kp, D)

    ref = reference_mhsa(x, params, num_heads=H)

    # float32 path (exact softmax reciprocal).
    out_f32 = jax.block_until_ready(
        multi_head_self_attention(x, params, num_heads=H,
                                  compute_dtype=jnp.float32))
    assert out_f32.shape == (B, S, D)
    np.testing.assert_allclose(np.asarray(out_f32), np.asarray(ref),
                               rtol=5e-3, atol=5e-3)

    # bf16 MXU-input path (f32 accumulation + f32 softmax stats).
    out_bf16 = jax.block_until_ready(
        multi_head_self_attention(x, params, num_heads=H,
                                  compute_dtype=jnp.bfloat16))
    np.testing.assert_allclose(np.asarray(out_bf16), np.asarray(ref),
                               rtol=3e-2, atol=3e-2)

    print("KERNEL_OK")
</pallas_src>

<mosaic_0001>
module attributes {stable_mosaic.version = 11 : i64} {
  func.func @qkv_proj_kernel(%arg0: i32, %arg1: memref<16x32xf32, #tpu.memory_space<vmem>>, %arg2: memref<32x96xf32, #tpu.memory_space<vmem>>, %arg3: memref<1x96xf32, #tpu.memory_space<vmem>>, %arg4: memref<16x32xf32, #tpu.memory_space<vmem>>, %arg5: memref<16x32xf32, #tpu.memory_space<vmem>>, %arg6: memref<16x32xf32, #tpu.memory_space<vmem>>) attributes {dimension_semantics = [#tpu.dimension_semantics<parallel>], iteration_bounds = array<i64: 1>, scalar_prefetch = 0 : i64, scratch_operands = 0 : i64, tpu.core_type = #tpu.core_type<tc>, window_params = [{transform_indices = @transform_0, window_bounds = array<i64: 16, 32>}, {pipeline_mode = #tpu.pipeline_mode<synchronous>, transform_indices = @transform_1, window_bounds = array<i64: 32, 96>}, {pipeline_mode = #tpu.pipeline_mode<synchronous>, transform_indices = @transform_2, window_bounds = array<i64: 1, 96>}, {transform_indices = @transform_3, window_bounds = array<i64: 16, 32>}, {transform_indices = @transform_4, window_bounds = array<i64: 16, 32>}, {transform_indices = @transform_5, window_bounds = array<i64: 16, 32>}]} {
    %c0 = arith.constant 0 : index
    %c0_0 = arith.constant 0 : index
    %0 = vector.load %arg1[%c0, %c0_0] : memref<16x32xf32, #tpu.memory_space<vmem>>, vector<16x32xf32>
    %c0_1 = arith.constant 0 : index
    %c0_2 = arith.constant 0 : index
    %1 = vector.load %arg2[%c0_1, %c0_2] : memref<32x96xf32, #tpu.memory_space<vmem>>, vector<32x96xf32>
    %cst = arith.constant dense<0.000000e+00> : vector<16x96xf32>
    %2 = tpu.matmul %0, %1, %cst {dimension_numbers = #tpu.dot_dimension_numbers<[1], [0], [0], [1], [0, 0, 1, 1], [], []>} : vector<16x32xf32>, vector<32x96xf32>, vector<16x96xf32> -> vector<16x96xf32>
    %c0_3 = arith.constant 0 : index
    %c0_4 = arith.constant 0 : index
    %3 = vector.load %arg3[%c0_3, %c0_4] : memref<1x96xf32, #tpu.memory_space<vmem>>, vector<1x96xf32>
    %4 = vector.broadcast %3 : vector<1x96xf32> to vector<16x96xf32>
    %5 = arith.addf %2, %4 : vector<16x96xf32>
    %6 = vector.extract_strided_slice %5 {offsets = [0, 0], sizes = [16, 32], strides = [1, 1]} : vector<16x96xf32> to vector<16x32xf32>
    %c0_5 = arith.constant 0 : index
    %c0_6 = arith.constant 0 : index
    %7 = vector.load %arg4[%c0_5, %c0_6] : memref<16x32xf32, #tpu.memory_space<vmem>>, vector<16x32xf32>
    tpu.vector_store %arg4[%c0_5, %c0_6], %6 {strides = array<i32>} : memref<16x32xf32, #tpu.memory_space<vmem>>, vector<16x32xf32>,
    %8 = vector.extract_strided_slice %5 {offsets = [0, 32], sizes = [16, 32], strides = [1, 1]} : vector<16x96xf32> to vector<16x32xf32>
    %c0_7 = arith.constant 0 : index
    %c0_8 = arith.constant 0 : index
    %9 = vector.load %arg5[%c0_7, %c0_8] : memref<16x32xf32, #tpu.memory_space<vmem>>, vector<16x32xf32>
    tpu.vector_store %arg5[%c0_7, %c0_8], %8 {strides = array<i32>} : memref<16x32xf32, #tpu.memory_space<vmem>>, vector<16x32xf32>,
    %10 = vector.extract_strided_slice %5 {offsets = [0, 64], sizes = [16, 32], strides = [1, 1]} : vector<16x96xf32> to vector<16x32xf32>
    %c0_9 = arith.constant 0 : index
    %c0_10 = arith.constant 0 : index
    %11 = vector.load %arg6[%c0_9, %c0_10] : memref<16x32xf32, #tpu.memory_space<vmem>>, vector<16x32xf32>
    tpu.vector_store %arg6[%c0_9, %c0_10], %10 {strides = array<i32>} : memref<16x32xf32, #tpu.memory_space<vmem>>, vector<16x32xf32>,
    return
  }
  func.func @transform_0(%arg0: i32) -> (i32, i32) {
    %c0_i32 = arith.constant 0 : i32
    %c0_i32_0 = arith.constant 0 : i32
    return %arg0, %c0_i32 : i32, i32
  }
  func.func @transform_1(%arg0: i32) -> (i32, i32) {
    %c0_i32 = arith.constant 0 : i32
    %c0_i32_0 = arith.constant 0 : i32
    %c0_i32_1 = arith.constant 0 : i32
    return %c0_i32, %c0_i32_0 : i32, i32
  }
  func.func @transform_2(%arg0: i32) -> (i32, i32) {
    %c0_i32 = arith.constant 0 : i32
    %c0_i32_0 = arith.constant 0 : i32
    %c0_i32_1 = arith.constant 0 : i32
    return %c0_i32, %c0_i32_0 : i32, i32
  }
  func.func @transform_3(%arg0: i32) -> (i32, i32) {
    %c0_i32 = arith.constant 0 : i32
    %c0_i32_0 = arith.constant 0 : i32
    return %arg0, %c0_i32 : i32, i32
  }
  func.func @transform_4(%arg0: i32) -> (i32, i32) {
    %c0_i32 = arith.constant 0 : i32
    %c0_i32_0 = arith.constant 0 : i32
    return %arg0, %c0_i32 : i32, i32
  }
  func.func @transform_5(%arg0: i32) -> (i32, i32) {
    %c0_i32 = arith.constant 0 : i32
    %c0_i32_0 = arith.constant 0 : i32
    return %arg0, %c0_i32 : i32, i32
  }
}

</mosaic_0001>

<bundles_post_ra>
// kernel: tpu_custom_call.1
= control target key start
LH: loop header
LB: loop body
LE: loop exit
PB: predicated region body
PF: predicated region fallthrough
CT: control target
= control target key end

     0   :  { %11 = vsyncpa [#allocation3], 0  ;;  %s498_s0 = inlined_call_operand.hbm [shape: f32[16,32], index: 0, kind: input, shape index: {}]   ;;  %s499_s1 = inlined_call_operand.hbm [shape: f32[32,96], index: 1, kind: input, shape index: {}]   ;;  %s500_s2 = inlined_call_operand.vmem [shape: f32[1,96], index: 2, kind: input, shape index: {}]   ;;  %s501_s3 = inlined_call_operand.hbm [shape: f32[16,32], index: 3, kind: output, shape index: {0}]   ;;  %s502_s4 = inlined_call_operand.hbm [shape: f32[16,32], index: 4, kind: output, shape index: {1}]   ;;  %s503_s5 = inlined_call_operand.hbm [shape: f32[16,32], index: 5, kind: output, shape index: {2}]  }
   0x1   :  { %12 = vsyncpa [#allocation6], 0 }
   0x2   :  { %13 = vsyncpa [#allocation4], 0 }
   0x3   :  { %14 = vsyncpa [#allocation9], 0  ;;  %s366_s18 = smov [#allocation2]   ;;  %s248_s22 = scalar_lea.hbm %s498_s0, 256 }
   0x4   :  { %s20_s19 = sshll.u32 %s366_s18, 4  ;;  %p249_p0 = scmp.ne.s32.totalorder %s498_s0, %s248_s22  ;;  %s21_s19 = int_to_ptr.vmem [resolvable:$true] %s20_s19 }
   0x5   :  { %p252_p1 = scmp.lt.u32.totalorder %s248_s22, %s498_s0 }
   0x7   :  { %p254_p2 = pnand %p252_p1, %p249_p0 }
   0x9   :  { %257 = shalt.err (!%p254_p2)
}
   0xa   :  { %s258_s27 = scalar_lea.vmem %s21_s19, 256  ;;  %p263_p4 = scmp.lt.s32.totalorder %s21_s19, %s21_s19 }
   0xb   :  { %p259_p3 = scmp.ne.s32.totalorder %s21_s19, %s258_s27  ;;  %p264_p5 = scmp.lt.s32.totalorder %s258_s27, %s258_s27 }
   0xd   :  { %p265_p6 = por %p264_p5, %p263_p4 }
   0xf   :  { %p266_p7 = pnand %p265_p6, %p259_p3 }
  0x11   :  { %269 = shalt.err (!%p266_p7)
}
  0x12   :  { %s367_s28 = smov 128   ;;  %s368_s29 = smov 8  }
  0x13   :  { %26 = dma.hbm_to_vmem [thread:$0]  %s498_s0, 256, %s21_s19, [#allocation3], %s367_s28, %s367_s28, %s368_s29  }
  0x14   :  { %s369_s7 = smov [#allocation5]   ;;  %s270_s11 = scalar_lea.hbm %s499_s1, 512 }
  0x15   :  { %s32_s8 = sshll.u32 %s369_s7, 4  ;;  %p271_p8 = scmp.ne.s32.totalorder %s499_s1, %s270_s11  ;;  %s33_s8 = int_to_ptr.vmem [resolvable:$true] %s32_s8 }
  0x16   :  { %p274_p9 = scmp.lt.u32.totalorder %s270_s11, %s499_s1 }
  0x18   :  { %p276_p10 = pnand %p274_p9, %p271_p8 }
  0x1a   :  { %279 = shalt.err (!%p276_p10)
}
  0x1b   :  { %s280_s16 = scalar_lea.vmem %s33_s8, 512  ;;  %p285_p12 = scmp.lt.s32.totalorder %s33_s8, %s33_s8 }
  0x1c   :  { %p281_p11 = scmp.ne.s32.totalorder %s33_s8, %s280_s16  ;;  %p286_p13 = scmp.lt.s32.totalorder %s280_s16, %s280_s16 }
  0x1e   :  { %p287_p0 = por %p286_p13, %p285_p12 }
  0x20   :  { %p288_p1 = pnand %p287_p0, %p281_p11 }
  0x22   :  { %291 = shalt.err (!%p288_p1)
}
  0x23   :  { %38 = dma.hbm_to_vmem [thread:$0]  %s499_s1, 512, %s33_s8, [#allocation6], %s367_s28, %s367_s28, %s368_s29  }
  0x24   :  { %358 = dma.done.wait [#allocation3], 256  }
  0x25   :  { %359 = vsyncadd [#allocation3], 4294967040 }
  0x26   :  { %360 = dma.done.wait [#allocation6], 512  }
  0x27   :  { %361 = vsyncadd [#allocation6], 4294966784  ;;  %vm60_vm0 = vcmask 261120   ;;  %v49_v0 = vld [vmem:[#allocation5] sm:$0xff]  ;;  %v50_v1 = vld [vmem:[#allocation5 + $0x8] sm:$0xff]  ;;  %s370_s19 = smov [#allocation7]  }
  0x28   :  { %v51_v2 = vld [vmem:[#allocation5 + $0x10] sm:$0xff]  ;;  %v231_v3 = vpack.c.bf16 %v50_v1, %v49_v0  ;;  %v52_v4 = vld [vmem:[#allocation5 + $0x18] sm:$0xff]  ;;  %s167_s20 = sshll.u32 %s370_s19, 4  ;;  %s371_s21 = smov 64   ;;  %s168_s20 = int_to_ptr.vmem [resolvable:$true] %s167_s20 }
  0x29   :  { %v47_v5 = vld [vmem:[#allocation2] sm:$0xff]  ;;  %v235_v6 = vpack.c.bf16 %v52_v4, %v51_v2  ;;  %v48_v7 = vld [vmem:[#allocation2 + $0x8] sm:$0xff]  ;;  %s372_s22 = smov 96   ;;  %s292_s23 = scalar_lea.vmem %s168_s20, 256 }
  0x2a   :  { %228 = vmatprep.mubr.msk.f32.mxu0 %vm60_vm0, %v47_v5  ;;  %232 = vmatprep.subr.bf16.mxu0 %v231_v3  ;;  %v211_v8 = vld [vmem:[%s500_s2] ss:$0 sm:$0xff]  ;;  %p293_p2 = scmp.ne.s32.totalorder %s168_s20, %s292_s23  ;;  %p297_p3 = scmp.lt.s32.totalorder %s168_s20, %s168_s20 }
  0x2b   :  { %234 = vmatpush3.bf16.msra.mxu0 %v231_v3  ;;  %p298_p4 = scmp.lt.s32.totalorder %s292_s23, %s292_s23 }
  0x2c   :  { %236 = vmatprep.subr.bf16.mxu0 %v235_v6 }
  0x2d   :  { %p299_p5 = por %p298_p4, %p297_p3 }
  0x2f   :  { %238 = vmatpush3.bf16.msra.mxu0 %v235_v6  ;;  %p300_p6 = pnand %p299_p5, %p293_p2 }
  0x32   :  { %229 = vmatmul.mubr.msk.f32.vlgmr.msra.gmra.mrb[0].mxu0 %vm60_vm0, %v48_v7 }
 0x105   :  { %v230_v9 = vpop.f32.mrb[0].mxu0 }
 0x106   :  { %v139_v10 = vadd.f32 %v230_v9, %v211_v8  ;;  %v133_v11 = vpop.f32.mrb[1].mxu0 }
 0x107   :  { %v134_v12 = vadd.f32 %v211_v8, %v133_v11 }
 0x108   :  { %143 = vst.msk [vmem:[#allocation7 + $0x8] sm:$0xff] %vm60_vm0, %v139_v10 }
 0x109   :  { %142 = vst.msk [vmem:[#allocation7] sm:$0xff] %vm60_vm0, %v134_v12  ;;  %154 = vrot.lane.b32.xlu1 %v134_v12, %s371_s21  ;;  %146 = vrot.lane.b32.xlu0 %v134_v12, %s372_s22 }
 0x10a   :  { %303 = shalt.err (!%p300_p6)
}
 0x10b   :  { %s304_s25 = scalar_lea.hbm %s501_s3, 256 }
 0x10c   :  { %p305_p7 = scmp.ne.s32.totalorder %s501_s3, %s304_s25  ;;  %p308_p8 = scmp.lt.u32.totalorder %s304_s25, %s501_s3 }
 0x10e   :  { %p310_p9 = pnand %p308_p8, %p305_p7 }
 0x110   :  { %313 = shalt.err (!%p310_p9)
}
 0x111   :  { %173 = dma.vmem_to_hbm [thread:$0]  %s168_s20, 256, %s501_s3, [#allocation4], %s367_s28, %s367_s28, %s368_s29  }
 0x112   :  { %156 = vrot.lane.b32.xlu1 %v139_v10, %s371_s21  ;;  %148 = vrot.lane.b32.xlu0 %v139_v10, %s372_s22  ;;  %s373_s9 = smov [#allocation8]   ;;  %s374_s11 = smov [#allocation10]  }
 0x113   :  { %s179_s10 = sshll.u32 %s373_s9, 4  ;;  %s191_s12 = sshll.u32 %s374_s11, 4  ;;  %s180_s10 = int_to_ptr.vmem [resolvable:$true] %s179_s10  ;;  %s459_s12 = int_to_ptr.vmem [resolvable:$true] %s191_s12 }
 0x114   :  { %s314_s3 = scalar_lea.vmem %s180_s10, 256  ;;  %p319_p11 = scmp.lt.s32.totalorder %s180_s10, %s180_s10 }
 0x115   :  { %p315_p10 = scmp.ne.s32.totalorder %s180_s10, %s314_s3  ;;  %p320_p12 = scmp.lt.s32.totalorder %s314_s3, %s314_s3 }
 0x117   :  { %p321_p13 = por %p320_p12, %p319_p11 }
 0x119   :  { %p322_p0 = pnand %p321_p13, %p315_p10 }
 0x17b   :  { %v155_v13 = vpop.permute.xlu1 %154  ;;  %v147_v14 = vpop.permute.xlu0 %146 }
 0x17c   :  { %160 = vst.msk [vmem:[#allocation10] sm:$0xff] %vm60_vm0, %v155_v13  ;;  %152 = vst.msk [vmem:[#allocation8] sm:$0xff] %vm60_vm0, %v147_v14 }
 0x184   :  { %v157_v15 = vpop.permute.xlu1 %156  ;;  %v149_v16 = vpop.permute.xlu0 %148 }
 0x185   :  { %161 = vst.msk [vmem:[#allocation10 + $0x8] sm:$0xff] %vm60_vm0, %v157_v15  ;;  %153 = vst.msk [vmem:[#allocation8 + $0x8] sm:$0xff] %vm60_vm0, %v149_v16 }
 0x186   :  { %325 = shalt.err (!%p322_p0)
}
 0x187   :  { %s326_s15 = scalar_lea.hbm %s502_s4, 256 }
 0x188   :  { %p327_p1 = scmp.ne.s32.totalorder %s502_s4, %s326_s15  ;;  %p330_p2 = scmp.lt.u32.totalorder %s326_s15, %s502_s4 }
 0x18a   :  { %p332_p3 = pnand %p330_p2, %p327_p1 }
 0x18c   :  { %335 = shalt.err (!%p332_p3)
}
 0x18d   :  { %185 = dma.vmem_to_hbm [thread:$0]  %s180_s10, 256, %s502_s4, [#allocation9], %s367_s28, %s367_s28, %s368_s29  }
 0x18e   :  { %s336_s20 = scalar_lea.vmem %s459_s12, 256  ;;  %p341_p5 = scmp.lt.s32.totalorder %s459_s12, %s459_s12 }
 0x18f   :  { %p337_p4 = scmp.ne.s32.totalorder %s459_s12, %s336_s20  ;;  %p342_p6 = scmp.lt.s32.totalorder %s336_s20, %s336_s20 }
 0x191   :  { %p343_p7 = por %p342_p6, %p341_p5 }
 0x193   :  { %p344_p8 = pnand %p343_p7, %p337_p4 }
 0x195   :  { %347 = shalt.err (!%p344_p8)
}
 0x196   :  { %s348_s23 = scalar_lea.hbm %s503_s5, 256 }
 0x197   :  { %p349_p9 = scmp.ne.s32.totalorder %s503_s5, %s348_s23  ;;  %p352_p10 = scmp.lt.u32.totalorder %s348_s23, %s503_s5 }
 0x199   :  { %p354_p11 = pnand %p352_p10, %p349_p9 }
 0x19b   :  { %357 = shalt.err (!%p354_p11)
}
 0x19c   :  { %197 = dma.vmem_to_hbm [thread:$0]  %s459_s12, 256, %s503_s5, [#allocation9], %s367_s28, %s367_s28, %s368_s29  }
 0x19d   :  { %362 = dma.done.wait [#allocation4], 256  }
 0x19e   :  { %363 = vsyncadd [#allocation4], 4294967040 }
 0x19f   :  { %364 = dma.done.wait [#allocation9], 512  }
 0x1a0   :  { %365 = vsyncadd [#allocation9], 4294966784 }
 0x1a1   :  { %207 = vsyncpa [#allocation3], 1 }
 0x1a2   :  { %208 = vsyncpa [#allocation6], 1 }
 0x1a3   :  { %209 = vsyncpa [#allocation4], 1 }
 0x1a4   :  { %210 = vsyncpa [#allocation9], 1 }

</bundles_post_ra>
